<compile_context>
chip_gen: v7x
topology: tpu7x:2x2x1
jax: 0.10.0
libtpu: 0.0.40
codegen_flags: <defaults>
</compile_context>

<pallas_src>
import jax
import jax.numpy as jnp
from jax.experimental import pallas as pl
from jax.experimental.pallas import tpu as pltpu


def mlp_kernel(x_ref, w1_ref, b1_ref, w2_ref, b2_ref, o_ref):
    """x_ref: (in_f, bn) VMEM, batch on lanes.  o_ref: (out_f, bn) VMEM.
    w1_ref: (hid, in_f) SMEM, b1_ref: (hid,) SMEM,
    w2_ref: (out_f, hid) SMEM, b2_ref: (out_f,) SMEM (PyTorch nn.Linear layout)."""
    hid, in_f = w1_ref.shape
    out_f = w2_ref.shape[0]

    # Load each feature row once: (1, bn) lane-dense slabs.
    xs = [x_ref[k:k + 1, :] for k in range(in_f)]

    # Hidden layer: unrolled VPU broadcast-MACs + ReLU. Weights come from SMEM
    # as scalars, so each term is a single scalar-broadcast multiply (no MXU).
    hs = []
    for j in range(hid):
        acc = xs[0] * w1_ref[j, 0]
        for k in range(1, in_f):
            acc = acc + xs[k] * w1_ref[j, k]
        hs.append(jnp.maximum(acc + b1_ref[j], 0.0))

    # Output layer: same pattern; each output row is a full lane-dense store.
    for i in range(out_f):
        acc = hs[0] * w2_ref[i, 0]
        for j in range(1, hid):
            acc = acc + hs[j] * w2_ref[i, j]
        o_ref[i:i + 1, :] = acc + b2_ref[i]


def net_forward(x, w1, b1, w2, b2, *, block_b=131072):
    """Forward pass of Net. x: (B, 3) f32. w1: (5, 3), b1: (5,), w2: (2, 5),
    b2: (2,) in PyTorch nn.Linear layout. Returns (B, 2)."""
    B, in_f = x.shape
    out_f = w2.shape[0]

    # Lane-dense layout: batch on the last (128-lane) axis.
    x_t = jnp.transpose(x)  # (in_f, B)

    # Batch tile: either the whole batch (any B is legal as a full-dim block),
    # or a multiple of 128 so lane tiling stays legal with a ragged last tile.
    if B <= block_b:
        bn = B
    else:
        bn = max((block_b // 128) * 128, 128)
    grid = (pl.cdiv(B, bn),)

    smem = pl.BlockSpec(memory_space=pltpu.MemorySpace.SMEM)

    out_t = pl.pallas_call(
        mlp_kernel,
        out_shape=jax.ShapeDtypeStruct((out_f, B), x.dtype),
        grid_spec=pltpu.PrefetchScalarGridSpec(
            num_scalar_prefetch=0,
            grid=grid,
            in_specs=[
                pl.BlockSpec((in_f, bn), lambda i: (0, i)),  # x^T batch tile
                smem,  # w1 (whole array, SMEM-resident across all grid steps)
                smem,  # b1
                smem,  # w2
                smem,  # b2
            ],
            out_specs=pl.BlockSpec((out_f, bn), lambda i: (0, i)),
        ),
        compiler_params=pltpu.CompilerParams(
            dimension_semantics=("parallel",)),  # lets v7x shard tiles over 2 TCs
    )(x_t, w1, b1, w2, b2)

    return jnp.transpose(out_t)  # (B, out_f)


def init_params(key):
    """Deterministic parameter init matching nn.Linear shapes (Kaiming-uniform-like)."""
    k1, k2, k3, k4 = jax.random.split(key, 4)
    # linear1: Linear(3, 5) -> weight (5, 3), bias (5,)
    bound1 = 1.0 / jnp.sqrt(3.0)
    w1 = jax.random.uniform(k1, (5, 3), jnp.float32, -bound1, bound1)
    b1 = jax.random.uniform(k2, (5,), jnp.float32, -bound1, bound1)
    # linear2: Linear(5, 2) -> weight (2, 5), bias (2,)
    bound2 = 1.0 / jnp.sqrt(5.0)
    w2 = jax.random.uniform(k3, (2, 5), jnp.float32, -bound2, bound2)
    b2 = jax.random.uniform(k4, (2,), jnp.float32, -bound2, bound2)
    return w1, b1, w2, b2


if __name__ == "__main__":
    key = jax.random.PRNGKey(0)
    kx, kp = jax.random.split(key)

    B = 384  # small batch; block_b=128 below exercises a 3-step grid
    x = jax.random.normal(kx, (B, 3), jnp.float32)
    w1, b1, w2, b2 = init_params(kp)

    out = net_forward(x, w1, b1, w2, b2, block_b=128)
    out = jax.block_until_ready(out)

    # Reference check in plain JAX (same semantics as the PyTorch module).
    y1 = x @ w1.T + b1
    y2 = jnp.maximum(y1, 0.0)
    ref = y2 @ w2.T + b2
    assert out.shape == (B, 2)
    assert jnp.allclose(out, ref, atol=1e-5, rtol=1e-5)

    print("KERNEL_OK")
</pallas_src>

<mosaic_0001>
module attributes {stable_mosaic.version = 11 : i64} {
  func.func @mlp_kernel(%arg0: i32, %arg1: memref<3x128xf32, #tpu.memory_space<vmem>>, %arg2: memref<5x3xf32, #tpu.memory_space<smem>>, %arg3: memref<5xf32, #tpu.memory_space<smem>>, %arg4: memref<2x5xf32, #tpu.memory_space<smem>>, %arg5: memref<2xf32, #tpu.memory_space<smem>>, %arg6: memref<2x128xf32, #tpu.memory_space<vmem>>) attributes {dimension_semantics = [#tpu.dimension_semantics<parallel>], iteration_bounds = array<i64: 3>, scalar_prefetch = 0 : i64, scratch_operands = 0 : i64, tpu.core_type = #tpu.core_type<tc>, window_params = [{transform_indices = @transform_0, window_bounds = array<i64: 3, 128>}, {transform_indices = @transform_1, window_bounds = array<i64: 5, 3>}, {transform_indices = @transform_2, window_bounds = array<i64: 5>}, {transform_indices = @transform_3, window_bounds = array<i64: 2, 5>}, {transform_indices = @transform_4, window_bounds = array<i64: 2>}, {transform_indices = @transform_5, window_bounds = array<i64: 2, 128>}]} {
    %c0 = arith.constant 0 : index
    %c0_0 = arith.constant 0 : index
    %0 = vector.load %arg1[%c0, %c0_0] : memref<3x128xf32, #tpu.memory_space<vmem>>, vector<1x128xf32>
    %c1 = arith.constant 1 : index
    %c0_1 = arith.constant 0 : index
    %1 = vector.load %arg1[%c1, %c0_1] : memref<3x128xf32, #tpu.memory_space<vmem>>, vector<1x128xf32>
    %c2 = arith.constant 2 : index
    %c0_2 = arith.constant 0 : index
    %2 = vector.load %arg1[%c2, %c0_2] : memref<3x128xf32, #tpu.memory_space<vmem>>, vector<1x128xf32>
    %c0_3 = arith.constant 0 : index
    %c0_4 = arith.constant 0 : index
    %3 = memref.load %arg2[%c0_3, %c0_4] : memref<5x3xf32, #tpu.memory_space<smem>>
    %4 = vector.broadcast %3 : f32 to vector<1x128xf32>
    %5 = arith.mulf %0, %4 : vector<1x128xf32>
    %c0_5 = arith.constant 0 : index
    %c1_6 = arith.constant 1 : index
    %6 = memref.load %arg2[%c0_5, %c1_6] : memref<5x3xf32, #tpu.memory_space<smem>>
    %7 = vector.broadcast %6 : f32 to vector<1x128xf32>
    %8 = arith.mulf %1, %7 : vector<1x128xf32>
    %9 = arith.addf %5, %8 : vector<1x128xf32>
    %c0_7 = arith.constant 0 : index
    %c2_8 = arith.constant 2 : index
    %10 = memref.load %arg2[%c0_7, %c2_8] : memref<5x3xf32, #tpu.memory_space<smem>>
    %11 = vector.broadcast %10 : f32 to vector<1x128xf32>
    %12 = arith.mulf %2, %11 : vector<1x128xf32>
    %13 = arith.addf %9, %12 : vector<1x128xf32>
    %c0_9 = arith.constant 0 : index
    %14 = memref.load %arg3[%c0_9] : memref<5xf32, #tpu.memory_space<smem>>
    %15 = vector.broadcast %14 : f32 to vector<1x128xf32>
    %16 = arith.addf %13, %15 : vector<1x128xf32>
    %cst = arith.constant 0.000000e+00 : f32
    %17 = vector.broadcast %cst : f32 to vector<1x128xf32>
    %18 = arith.maximumf %16, %17 : vector<1x128xf32>
    %c1_10 = arith.constant 1 : index
    %c0_11 = arith.constant 0 : index
    %19 = memref.load %arg2[%c1_10, %c0_11] : memref<5x3xf32, #tpu.memory_space<smem>>
    %20 = vector.broadcast %19 : f32 to vector<1x128xf32>
    %21 = arith.mulf %0, %20 : vector<1x128xf32>
    %c1_12 = arith.constant 1 : index
    %c1_13 = arith.constant 1 : index
    %22 = memref.load %arg2[%c1_12, %c1_13] : memref<5x3xf32, #tpu.memory_space<smem>>
    %23 = vector.broadcast %22 : f32 to vector<1x128xf32>
    %24 = arith.mulf %1, %23 : vector<1x128xf32>
    %25 = arith.addf %21, %24 : vector<1x128xf32>
    %c1_14 = arith.constant 1 : index
    %c2_15 = arith.constant 2 : index
    %26 = memref.load %arg2[%c1_14, %c2_15] : memref<5x3xf32, #tpu.memory_space<smem>>
    %27 = vector.broadcast %26 : f32 to vector<1x128xf32>
    %28 = arith.mulf %2, %27 : vector<1x128xf32>
    %29 = arith.addf %25, %28 : vector<1x128xf32>
    %c1_16 = arith.constant 1 : index
    %30 = memref.load %arg3[%c1_16] : memref<5xf32, #tpu.memory_space<smem>>
    %31 = vector.broadcast %30 : f32 to vector<1x128xf32>
    %32 = arith.addf %29, %31 : vector<1x128xf32>
    %cst_17 = arith.constant 0.000000e+00 : f32
    %33 = vector.broadcast %cst_17 : f32 to vector<1x128xf32>
    %34 = arith.maximumf %32, %33 : vector<1x128xf32>
    %c2_18 = arith.constant 2 : index
    %c0_19 = arith.constant 0 : index
    %35 = memref.load %arg2[%c2_18, %c0_19] : memref<5x3xf32, #tpu.memory_space<smem>>
    %36 = vector.broadcast %35 : f32 to vector<1x128xf32>
    %37 = arith.mulf %0, %36 : vector<1x128xf32>
    %c2_20 = arith.constant 2 : index
    %c1_21 = arith.constant 1 : index
    %38 = memref.load %arg2[%c2_20, %c1_21] : memref<5x3xf32, #tpu.memory_space<smem>>
    %39 = vector.broadcast %38 : f32 to vector<1x128xf32>
    %40 = arith.mulf %1, %39 : vector<1x128xf32>
    %41 = arith.addf %37, %40 : vector<1x128xf32>
    %c2_22 = arith.constant 2 : index
    %c2_23 = arith.constant 2 : index
    %42 = memref.load %arg2[%c2_22, %c2_23] : memref<5x3xf32, #tpu.memory_space<smem>>
    %43 = vector.broadcast %42 : f32 to vector<1x128xf32>
    %44 = arith.mulf %2, %43 : vector<1x128xf32>
    %45 = arith.addf %41, %44 : vector<1x128xf32>
    %c2_24 = arith.constant 2 : index
    %46 = memref.load %arg3[%c2_24] : memref<5xf32, #tpu.memory_space<smem>>
    %47 = vector.broadcast %46 : f32 to vector<1x128xf32>
    %48 = arith.addf %45, %47 : vector<1x128xf32>
    %cst_25 = arith.constant 0.000000e+00 : f32
    %49 = vector.broadcast %cst_25 : f32 to vector<1x128xf32>
    %50 = arith.maximumf %48, %49 : vector<1x128xf32>
    %c3 = arith.constant 3 : index
    %c0_26 = arith.constant 0 : index
    %51 = memref.load %arg2[%c3, %c0_26] : memref<5x3xf32, #tpu.memory_space<smem>>
    %52 = vector.broadcast %51 : f32 to vector<1x128xf32>
    %53 = arith.mulf %0, %52 : vector<1x128xf32>
    %c3_27 = arith.constant 3 : index
    %c1_28 = arith.constant 1 : index
    %54 = memref.load %arg2[%c3_27, %c1_28] : memref<5x3xf32, #tpu.memory_space<smem>>
    %55 = vector.broadcast %54 : f32 to vector<1x128xf32>
    %56 = arith.mulf %1, %55 : vector<1x128xf32>
    %57 = arith.addf %53, %56 : vector<1x128xf32>
    %c3_29 = arith.constant 3 : index
    %c2_30 = arith.constant 2 : index
    %58 = memref.load %arg2[%c3_29, %c2_30] : memref<5x3xf32, #tpu.memory_space<smem>>
    %59 = vector.broadcast %58 : f32 to vector<1x128xf32>
    %60 = arith.mulf %2, %59 : vector<1x128xf32>
    %61 = arith.addf %57, %60 : vector<1x128xf32>
    %c3_31 = arith.constant 3 : index
    %62 = memref.load %arg3[%c3_31] : memref<5xf32, #tpu.memory_space<smem>>
    %63 = vector.broadcast %62 : f32 to vector<1x128xf32>
    %64 = arith.addf %61, %63 : vector<1x128xf32>
    %cst_32 = arith.constant 0.000000e+00 : f32
    %65 = vector.broadcast %cst_32 : f32 to vector<1x128xf32>
    %66 = arith.maximumf %64, %65 : vector<1x128xf32>
    %c4 = arith.constant 4 : index
    %c0_33 = arith.constant 0 : index
    %67 = memref.load %arg2[%c4, %c0_33] : memref<5x3xf32, #tpu.memory_space<smem>>
    %68 = vector.broadcast %67 : f32 to vector<1x128xf32>
    %69 = arith.mulf %0, %68 : vector<1x128xf32>
    %c4_34 = arith.constant 4 : index
    %c1_35 = arith.constant 1 : index
    %70 = memref.load %arg2[%c4_34, %c1_35] : memref<5x3xf32, #tpu.memory_space<smem>>
    %71 = vector.broadcast %70 : f32 to vector<1x128xf32>
    %72 = arith.mulf %1, %71 : vector<1x128xf32>
    %73 = arith.addf %69, %72 : vector<1x128xf32>
    %c4_36 = arith.constant 4 : index
    %c2_37 = arith.constant 2 : index
    %74 = memref.load %arg2[%c4_36, %c2_37] : memref<5x3xf32, #tpu.memory_space<smem>>
    %75 = vector.broadcast %74 : f32 to vector<1x128xf32>
    %76 = arith.mulf %2, %75 : vector<1x128xf32>
    %77 = arith.addf %73, %76 : vector<1x128xf32>
    %c4_38 = arith.constant 4 : index
    %78 = memref.load %arg3[%c4_38] : memref<5xf32, #tpu.memory_space<smem>>
    %79 = vector.broadcast %78 : f32 to vector<1x128xf32>
    %80 = arith.addf %77, %79 : vector<1x128xf32>
    %cst_39 = arith.constant 0.000000e+00 : f32
    %81 = vector.broadcast %cst_39 : f32 to vector<1x128xf32>
    %82 = arith.maximumf %80, %81 : vector<1x128xf32>
    %c0_40 = arith.constant 0 : index
    %c0_41 = arith.constant 0 : index
    %83 = memref.load %arg4[%c0_40, %c0_41] : memref<2x5xf32, #tpu.memory_space<smem>>
    %84 = vector.broadcast %83 : f32 to vector<1x128xf32>
    %85 = arith.mulf %18, %84 : vector<1x128xf32>
    %c0_42 = arith.constant 0 : index
    %c1_43 = arith.constant 1 : index
    %86 = memref.load %arg4[%c0_42, %c1_43] : memref<2x5xf32, #tpu.memory_space<smem>>
    %87 = vector.broadcast %86 : f32 to vector<1x128xf32>
    %88 = arith.mulf %34, %87 : vector<1x128xf32>
    %89 = arith.addf %85, %88 : vector<1x128xf32>
    %c0_44 = arith.constant 0 : index
    %c2_45 = arith.constant 2 : index
    %90 = memref.load %arg4[%c0_44, %c2_45] : memref<2x5xf32, #tpu.memory_space<smem>>
    %91 = vector.broadcast %90 : f32 to vector<1x128xf32>
    %92 = arith.mulf %50, %91 : vector<1x128xf32>
    %93 = arith.addf %89, %92 : vector<1x128xf32>
    %c0_46 = arith.constant 0 : index
    %c3_47 = arith.constant 3 : index
    %94 = memref.load %arg4[%c0_46, %c3_47] : memref<2x5xf32, #tpu.memory_space<smem>>
    %95 = vector.broadcast %94 : f32 to vector<1x128xf32>
    %96 = arith.mulf %66, %95 : vector<1x128xf32>
    %97 = arith.addf %93, %96 : vector<1x128xf32>
    %c0_48 = arith.constant 0 : index
    %c4_49 = arith.constant 4 : index
    %98 = memref.load %arg4[%c0_48, %c4_49] : memref<2x5xf32, #tpu.memory_space<smem>>
    %99 = vector.broadcast %98 : f32 to vector<1x128xf32>
    %100 = arith.mulf %82, %99 : vector<1x128xf32>
    %101 = arith.addf %97, %100 : vector<1x128xf32>
    %c0_50 = arith.constant 0 : index
    %102 = memref.load %arg5[%c0_50] : memref<2xf32, #tpu.memory_space<smem>>
    %103 = vector.broadcast %102 : f32 to vector<1x128xf32>
    %104 = arith.addf %101, %103 : vector<1x128xf32>
    %c0_51 = arith.constant 0 : index
    %c0_52 = arith.constant 0 : index
    %105 = vector.load %arg6[%c0_51, %c0_52] : memref<2x128xf32, #tpu.memory_space<vmem>>, vector<1x128xf32>
    tpu.vector_store %arg6[%c0_51, %c0_52], %104 {strides = array<i32>} : memref<2x128xf32, #tpu.memory_space<vmem>>, vector<1x128xf32>,
    %c1_53 = arith.constant 1 : index
    %c0_54 = arith.constant 0 : index
    %106 = memref.load %arg4[%c1_53, %c0_54] : memref<2x5xf32, #tpu.memory_space<smem>>
    %107 = vector.broadcast %106 : f32 to vector<1x128xf32>
    %108 = arith.mulf %18, %107 : vector<1x128xf32>
    %c1_55 = arith.constant 1 : index
    %c1_56 = arith.constant 1 : index
    %109 = memref.load %arg4[%c1_55, %c1_56] : memref<2x5xf32, #tpu.memory_space<smem>>
    %110 = vector.broadcast %109 : f32 to vector<1x128xf32>
    %111 = arith.mulf %34, %110 : vector<1x128xf32>
    %112 = arith.addf %108, %111 : vector<1x128xf32>
    %c1_57 = arith.constant 1 : index
    %c2_58 = arith.constant 2 : index
    %113 = memref.load %arg4[%c1_57, %c2_58] : memref<2x5xf32, #tpu.memory_space<smem>>
    %114 = vector.broadcast %113 : f32 to vector<1x128xf32>
    %115 = arith.mulf %50, %114 : vector<1x128xf32>
    %116 = arith.addf %112, %115 : vector<1x128xf32>
    %c1_59 = arith.constant 1 : index
    %c3_60 = arith.constant 3 : index
    %117 = memref.load %arg4[%c1_59, %c3_60] : memref<2x5xf32, #tpu.memory_space<smem>>
    %118 = vector.broadcast %117 : f32 to vector<1x128xf32>
    %119 = arith.mulf %66, %118 : vector<1x128xf32>
    %120 = arith.addf %116, %119 : vector<1x128xf32>
    %c1_61 = arith.constant 1 : index
    %c4_62 = arith.constant 4 : index
    %121 = memref.load %arg4[%c1_61, %c4_62] : memref<2x5xf32, #tpu.memory_space<smem>>
    %122 = vector.broadcast %121 : f32 to vector<1x128xf32>
    %123 = arith.mulf %82, %122 : vector<1x128xf32>
    %124 = arith.addf %120, %123 : vector<1x128xf32>
    %c1_63 = arith.constant 1 : index
    %125 = memref.load %arg5[%c1_63] : memref<2xf32, #tpu.memory_space<smem>>
    %126 = vector.broadcast %125 : f32 to vector<1x128xf32>
    %127 = arith.addf %124, %126 : vector<1x128xf32>
    %c1_64 = arith.constant 1 : index
    %c0_65 = arith.constant 0 : index
    %128 = vector.load %arg6[%c1_64, %c0_65] : memref<2x128xf32, #tpu.memory_space<vmem>>, vector<1x128xf32>
    tpu.vector_store %arg6[%c1_64, %c0_65], %127 {strides = array<i32>} : memref<2x128xf32, #tpu.memory_space<vmem>>, vector<1x128xf32>,
    return
  }
  func.func @transform_0(%arg0: i32) -> (i32, i32) {
    %c0_i32 = arith.constant 0 : i32
    %c0_i32_0 = arith.constant 0 : i32
    return %c0_i32, %arg0 : i32, i32
  }
  func.func @transform_1(%arg0: i32) -> (i32, i32) {
    %c0_i32 = arith.constant 0 : i32
    %c0_i32_0 = arith.constant 0 : i32
    %c0_i32_1 = arith.constant 0 : i32
    return %c0_i32, %c0_i32_0 : i32, i32
  }
  func.func @transform_2(%arg0: i32) -> i32 {
    %c0_i32 = arith.constant 0 : i32
    %c0_i32_0 = arith.constant 0 : i32
    return %c0_i32 : i32
  }
  func.func @transform_3(%arg0: i32) -> (i32, i32) {
    %c0_i32 = arith.constant 0 : i32
    %c0_i32_0 = arith.constant 0 : i32
    %c0_i32_1 = arith.constant 0 : i32
    return %c0_i32, %c0_i32_0 : i32, i32
  }
  func.func @transform_4(%arg0: i32) -> i32 {
    %c0_i32 = arith.constant 0 : i32
    %c0_i32_0 = arith.constant 0 : i32
    return %c0_i32 : i32
  }
  func.func @transform_5(%arg0: i32) -> (i32, i32) {
    %c0_i32 = arith.constant 0 : i32
    %c0_i32_0 = arith.constant 0 : i32
    return %c0_i32, %arg0 : i32, i32
  }
}

</mosaic_0001>

<bundles_post_ra>
// kernel: tpu_custom_call.1
= control target key start
LH: loop header
LB: loop body
LE: loop exit
PB: predicated region body
PF: predicated region fallthrough
CT: control target
= control target key end

     0   :  { %10 = vsyncpa [#allocation4], 0  ;;  %s1082_s0 = inlined_call_operand.vmem [shape: f32[3,384], index: 0, kind: input, shape index: {}]   ;;  %s1083_s1 = inlined_call_operand.vmem [shape: f32[5,3], index: 1, kind: input, shape index: {}]   ;;  %s1084_s2 = inlined_call_operand.vmem [shape: f32[5], index: 2, kind: input, shape index: {}]   ;;  %s1085_s3 = inlined_call_operand.vmem [shape: f32[2,5], index: 3, kind: input, shape index: {}]   ;;  %s1086_s4 = inlined_call_operand.vmem [shape: f32[2], index: 4, kind: input, shape index: {}]   ;;  %s1087_s5 = inlined_call_operand.hbm [shape: f32[2,384], index: 5, kind: output, shape index: {}]  }
   0x1   :  { %11 = vsyncpa [#allocation6], 0 }
   0x2   :  { %12 = vsyncpa [#allocation9], 0 }
   0x3   :  { %13 = vsyncpa [#allocation3], 0 }
   0x4   :  { %15 = vsyncpa [#allocation3 + $0x1], 0  ;;  %s807_s18 = smov 0   ;;  %s809_s19 = smov 0  }
   0x5   :  { %s811_s20 = smov 0   ;;  %s813_s21 = smov 0  }
   0x6 LB: > { %s828_s22 = sadd.s32 4294967295, %s770_s21   ;;  %s510_s23 = sadd.s32 4294967294, %s770_s21   ;;  %s770_s21 = sphi %s813_s21, %s1107_s21   ;;  %s766_s20 = sphi %s811_s20, %s1106_s20   ;;  %s762_s19 = sphi %s809_s19, %s1105_s19   ;;  %s758_s18 = sphi %s807_s18, %s1104_s18  }
   0x7   : > { %s832_s24 = sadd.s32 1, %s770_s21   ;;  %s138_s25 = sadd.s32 1, %s766_s20 }
   0x8   : > { %s135_s26 = ssub.s32 %s770_s21, %s832_s24  ;;  %p148_p0 = scmp.ne.s32.totalorder %s766_s20, %s762_s19 }
   0x9   : > { %p136_p1 = scmp.eq.s32.totalorder %s135_s26, 0  ;;  %p149_p2 = scmp.eq.s32.totalorder %s828_s22, 2 }
   0xa   : > { %p154_p3 = scmp.ne.s32.totalorder %s762_s19, %s758_s18  ;;  %p155_p4 = scmp.eq.s32.totalorder %s510_s23, 2 }
   0xb   : > { %s843_s27 = scalar_select %p136_p1, %s766_s20, %s138_s25  }
   0xc   : > { %p845_p5 = por %p149_p2, %p148_p0  ;;  %p849_p6 = por %p155_p4, %p154_p3 }
   0xd   : > { %p511_p7 = scmp.ge.s32.totalorder %s770_s21, 1  ;;  %p162_p8 = scmp.lt.s32.totalorder %s770_s21, 4 }
   0xe   : > { %s1091_s28 = scalar_select %p845_p5, 1, 0 }
   0xf   : > { %s1092_s29 = scalar_select %p849_p6, 1, 0 }
  0x10   : > { %p1088_p9 = scmp.eq.s32.totalorder %s828_s22, 0  ;;  %p856_p10 = pnand %p511_p7, %p162_p8 }
  0x11   : > { %s186_s8 = sshll.u32 %s1084_s2, 4  ;;  %s175_s11 = sshll.u32 %s1083_s1, 4  ;;  %s187_s8 = int_to_ptr.vmem [resolvable:$true] %s186_s8  ;;  %s176_s11 = int_to_ptr.vmem [resolvable:$true] %s175_s11 }
  0x12   : > { %s1093_s30 = scalar_select %p856_p10, 1, 0 }
  0x13   : > { %p574_p11 = pneg %p856_p10  ;;  %s197_s15 = sshll.u32 %s1085_s3, 4  ;;  %s877_s15 = int_to_ptr.vmem [resolvable:$true] %s197_s15 }
  0x14   : > { %s208_s23 = sshll.u32 %s1086_s4, 4  ;;  %s636_s25 = scalar_lea.vmem %s187_s8, 16  ;;  %s209_s23 = int_to_ptr.vmem [resolvable:$true] %s208_s23 }
  0x15   : > { %p870_p12 = pnand %p1088_p9, %p574_p11  ;;  %p637_p13 = scmp.ne.s32.totalorder %s187_s8, %s636_s25 }
  0x16   : > { %p644_p3 = scmp.lt.s32.totalorder %s187_s8, %s187_s8  ;;  %p645_p4 = scmp.lt.s32.totalorder %s636_s25, %s636_s25 }
  0x17   : > { %p638_p0 = pneg %p870_p12 }
  0x18   : > { %p646_p7 = por %p645_p4, %p644_p3 }
  0x19   : > { %p639_p1 = pnand %p638_p0, %p637_p13 }
  0x1b   : > { %p640_p2 = pneg %p639_p1 }
  0x1d   : > { %p647_p8 = pnand %p646_p7, %p640_p2 }
  0x1f   : > { %650 = shalt.err (!%p647_p8)
}
  0x20   : > { %s772_s26 = smov [#allocation5]   ;;  %s651_s6 = scalar_lea.vmem %s176_s11, 128 }
  0x21   : > { %580 = dma.vmem_to_smem (!%p870_p12), %s187_s8, 16, %s772_s26, [#allocation6]  }
  0x22   : > { %p652_p11 = scmp.ne.s32.totalorder %s176_s11, %s651_s6  ;;  %p659_p5 = scmp.lt.s32.totalorder %s176_s11, %s176_s11 }
  0x23   : > { %p660_p10 = scmp.lt.s32.totalorder %s651_s6, %s651_s6 }
  0x24   : > { %p654_p9 = pnand %p652_p11, %p638_p0 }
  0x25   : > { %p661_p13 = por %p660_p10, %p659_p5 }
  0x26   : > { %p655_p6 = pneg %p654_p9 }
  0x28   : > { %p662_p1 = pnand %p661_p13, %p655_p6 }
  0x2a   : > { %665 = shalt.err (!%p662_p1)
}
  0x2b   : > { %s773_s7 = smov [#allocation2]   ;;  %s666_s8 = scalar_lea.vmem %s877_s15, 32 }
  0x2c   : > { %577 = dma.vmem_to_smem (!%p870_p12), %s176_s11, 128, %s773_s7, [#allocation4]  }
  0x2d   : > { %p667_p2 = scmp.ne.s32.totalorder %s877_s15, %s666_s8  ;;  %p674_p9 = scmp.lt.s32.totalorder %s877_s15, %s877_s15 }
  0x2e   : > { %p675_p7 = scmp.lt.s32.totalorder %s666_s8, %s666_s8 }
  0x2f   : > { %p669_p3 = pnand %p667_p2, %p638_p0 }
  0x30   : > { %p676_p5 = por %p675_p7, %p674_p9 }
  0x31   : > { %p670_p4 = pneg %p669_p3 }
  0x33   : > { %p677_p6 = pnand %p676_p5, %p670_p4 }
  0x35   : > { %680 = shalt.err (!%p677_p6)
}
  0x36   : > { %s774_s9 = smov [#allocation7]   ;;  %s681_s13 = scalar_lea.vmem %s209_s23, 16 }
  0x37   : > { %583 = dma.vmem_to_smem (!%p870_p12), %s877_s15, 32, %s774_s9, [#allocation6]  }
  0x38   : > { %p682_p10 = scmp.ne.s32.totalorder %s209_s23, %s681_s13  ;;  %p689_p13 = scmp.lt.s32.totalorder %s209_s23, %s209_s23 }
  0x39   : > { %p690_p1 = scmp.lt.s32.totalorder %s681_s13, %s681_s13 }
  0x3a   : > { %p684_p8 = pnand %p682_p10, %p638_p0 }
  0x3b   : > { %p691_p2 = por %p690_p1, %p689_p13 }
  0x3c   : > { %p685_p11 = pneg %p684_p8 }
  0x3e   : > { %p692_p3 = pnand %p691_p2, %p685_p11 }
  0x40   : > { %695 = shalt.err (!%p692_p3)
}
  0x41   : > { %s775_s14 = smov [#allocation8]   ;;  %p1095_p4 = scmp.ne.s32.totalorder %s1093_s30, 0 }
  0x42   : > { %586 = dma.vmem_to_smem (!%p870_p12), %s209_s23, 16, %s775_s14, [#allocation9]  }
  0x43   : > { %228 = sbr.rel (%p1095_p4) target bundleno = 136 (0x88), region = 40  ;;  %p1096_p9 = scmp.eq.s32.totalorder (!%p1095_p4), %s828_s22, 0 }
  0x4a   : > { %741 = dma.done.wait (%p1096_p9), [#allocation4], 128   ;;  %p1097_p7 = pmov %p1096_p9 }
  0x4c   : > { %743 = vsyncadd (%p1097_p7), [#allocation4], 4294967168  ;;  %p1098_p0 = pmov %p1097_p7 }
  0x4e   : > { %745 = dma.done.wait (%p1098_p0), [#allocation6], 48   ;;  %p1099_p5 = pmov %p1098_p0 }
  0x4f   : > { %p1100_p6 = pmov %p1098_p0 }
  0x50   : > { %747 = vsyncadd (%p1099_p5), [#allocation6], 4294967248 }
  0x51   : > { %749 = dma.done.wait (%p1100_p6), [#allocation9], 16   ;;  %p1101_p12 = pmov %p1098_p0 }
  0x53   : > { %751 = vsyncadd (%p1101_p12), [#allocation9], 4294967280 }
  0x54   : > { %246 = sfence }
  0x55   : > { %p268_p10 = scmp.lt.s32.totalorder %s828_s22, 2  ;;  %s275_s30 = sld [smem:[#allocation2]] }
  0x56   : > { %s524_s12 = sld [smem:[#allocation2 + $0x1]]  ;;  %s525_s16 = sld [smem:[#allocation2 + $0x2]] }
  0x57   : > { %s269_s15 = scalar_select %p268_p10, %s828_s22, 2 }
  0x58   : > { %s929_s17 = sld [smem:[#allocation5]]  ;;  %s527_s8 = sld [smem:[#allocation2 + $0x81]] }
  0x59   : > { %s523_s23 = sshll.u32 %s269_s15, 2  ;;  %s526_s25 = sld [smem:[#allocation2 + $0x80]] }
  0x5a   : > { %s271_s7 = scalar_lea.vmem %s1082_s0, %s523_s23  ;;  %s528_s9 = sld [smem:[#allocation2 + $0x82]] }
  0x5b   : > { %v934_v0 = vld [vmem:[%s271_s7] sm:$0x1]  ;;  %v936_v1 = vld [vmem:[%s271_s7 + $0x1] sm:$0x1]  ;;  %v276_v2 = vstv %s275_s30  ;;  %v938_v3 = vld [vmem:[%s271_s7 + $0x2] sm:$0x1] }
  0x5c   : > { %v277_v4 = vmul.f32 %v276_v2, %v934_v0  ;;  %v279_v5 = vstv %s524_s12  ;;  %s941_s10 = sld [smem:[#allocation5 + $0x1]]  ;;  %s530_s11 = sld [smem:[#allocation2 + $0x100]]  ;;  %v283_v7 = vstv %s525_s16 }
  0x5d   : > { %v280_v6 = vmul.f32 %v279_v5, %v936_v1  ;;  %s944_s13 = sld [smem:[#allocation2 + $0x101]]  ;;  %s946_s14 = sld [smem:[#allocation2 + $0x102]]  ;;  %v284_v9 = vmul.f32 %v283_v7, %v938_v3 }
  0x5e   : > { %s948_s15 = sld [smem:[#allocation5 + $0x2]]  ;;  %s951_s30 = sld [smem:[#allocation2 + $0x180]]  ;;  %v287_v11 = vstv %s929_s17  ;;  %v294_v13 = vstv %s527_s8 }
  0x5f   : > { %v281_v8 = vadd.f32 %v280_v6, %v277_v4  ;;  %v291_v10 = vstv %s526_s25  ;;  %s953_s12 = sld [smem:[#allocation2 + $0x181]]  ;;  %s957_s23 = sld [smem:[#allocation2 + $0x182]]  ;;  %v295_v15 = vmul.f32 %v294_v13, %v936_v1 }
  0x60   : > { %v292_v12 = vmul.f32 %v291_v10, %v934_v0  ;;  %s960_s16 = sld [smem:[#allocation2 + $0x200]]  ;;  %s962_s26 = sld [smem:[#allocation2 + $0x201]]  ;;  %v298_v16 = vstv %s528_s9 }
  0x61   : > { %v285_v14 = vadd.f32 %v284_v9, %v281_v8  ;;  %s964_s25 = sld [smem:[#allocation5 + $0x3]]  ;;  %s966_s6 = sld [smem:[#allocation2 + $0x202]]  ;;  %v299_v19 = vmul.f32 %v298_v16, %v938_v3 }
  0x62   : > { %v296_v18 = vadd.f32 %v295_v15, %v292_v12  ;;  %v306_v20 = vstv %s530_s11  ;;  %s971_s17 = sld [smem:[#allocation7]]  ;;  %s973_s7 = sld [smem:[#allocation7 + $0x1]]  ;;  %v302_v21 = vstv %s941_s10 }
  0x63   : > { %v968_v17 = vadd.f32 %v287_v11, %v285_v14  ;;  %v307_v22 = vmul.f32 %v306_v20, %v934_v0  ;;  %v309_v23 = vstv %s944_s13  ;;  %v313_v24 = vstv %s946_s14  ;;  %s979_s8 = sld [smem:[#allocation5 + $0x4]]  ;;  %s981_s9 = sld [smem:[#allocation7 + $0x2]] }
  0x64   : > { %v300_v25 = vadd.f32 %v299_v19, %v296_v18  ;;  %v310_v26 = vmul.f32 %v309_v23, %v936_v1  ;;  %v314_v27 = vmul.f32 %v313_v24, %v938_v3  ;;  %v317_v28 = vstv %s948_s15  ;;  %s986_s11 = sld [smem:[#allocation7 + $0x3]]  ;;  %s988_s10 = sld [smem:[#allocation7 + $0x4]] }
  0x65   : > { %v289_v29 = vmax.f32 %v968_v17, 0.0  ;;  %v321_v30 = vstv %s951_s30  ;;  %v324_v31 = vstv %s953_s12  ;;  %v328_v32 = vstv %s957_s23  ;;  %s996_s13 = sld [smem:[#allocation7 + $0x80]]  ;;  %s1002_s14 = sld [smem:[#allocation7 + $0x81]] }
  0x66   : > { %v303_v33 = vadd.f32 %v302_v21, %v300_v25  ;;  %v311_v34 = vadd.f32 %v310_v26, %v307_v22  ;;  %v322_v35 = vmul.f32 %v321_v30, %v934_v0  ;;  %v325_v36 = vmul.f32 %v324_v31, %v936_v1  ;;  %s1004_s15 = sld [smem:[#allocation7 + $0x82]]  ;;  %s1007_s30 = sld [smem:[#allocation7 + $0x83]] }
  0x67   : > { %v329_v37 = vmul.f32 %v328_v32, %v938_v3  ;;  %v336_v38 = vstv %s960_s16  ;;  %v339_v39 = vstv %s962_s26  ;;  %v343_v40 = vstv %s966_s6  ;;  %s1009_s12 = sld [smem:[#allocation7 + $0x84]]  ;;  %s265_s23 = sand.u32 1, %s762_s19  }
  0x68   : > { %v304_v41 = vmax.f32 %v303_v33, 0.0  ;;  %v315_v42 = vadd.f32 %v314_v27, %v311_v34  ;;  %v326_v43 = vadd.f32 %v325_v36, %v322_v35  ;;  %v337_v44 = vmul.f32 %v336_v38, %v934_v0  ;;  %s1021_s16 = sld [smem:[#allocation8]]  ;;  %s1025_s26 = sld [smem:[#allocation8 + $0x1]] }
  0x69   : > { %v332_v45 = vstv %s964_s25  ;;  %v340_v46 = vmul.f32 %v339_v39, %v936_v1  ;;  %v344_v47 = vmul.f32 %v343_v40, %v938_v3  ;;  %v351_v48 = vstv %s971_s17  ;;  %s522_s25 = sshll.u32 %s265_s23, 1  ;;  %p1102_p11 = scmp.ne.s32.totalorder %s1091_s28, 0 }
  0x6a   : > { %v318_v49 = vadd.f32 %v317_v28, %v315_v42  ;;  %v330_v50 = vadd.f32 %v329_v37, %v326_v43  ;;  %v352_v51 = vmul.f32 %v351_v48, %v289_v29  ;;  %v354_v52 = vstv %s973_s7  ;;  %s267_s6 = scalar_lea.vmem [#allocation10], %s522_s25  ;;  %s553_s7 = sshll.u32 %s828_s22, 5 }
  0x6b   : > { %v341_v53 = vadd.f32 %v340_v46, %v337_v44  ;;  %v347_v54 = vstv %s979_s8  ;;  %v355_v55 = vmul.f32 %v354_v52, %v304_v41  ;;  %v358_v56 = vstv %s981_s9  ;;  %s410_s17 = sshll.u32 %s267_s6, 4  ;;  %s776_s22 = smov [#allocation10]   ;;  %s1035_s17 = int_to_ptr.vmem [resolvable:$true] %s410_s17 }
  0x6c   : > { %v319_v57 = vmax.f32 %v318_v49, 0.0  ;;  %v333_v58 = vadd.f32 %v332_v45, %v330_v50  ;;  %v362_v59 = vstv %s986_s11  ;;  %v366_v60 = vstv %s988_s10  ;;  %s1040_s11 = scalar_lea.hbm %s1087_s5, %s553_s7  ;;  %s397_s10 = scalar_lea.sflag [#allocation3], %s265_s23 }
  0x6d   : > { %v345_v61 = vadd.f32 %v344_v47, %v341_v53  ;;  %v356_v62 = vadd.f32 %v355_v55, %v352_v51  ;;  %v374_v63 = vstv %s996_s13  ;;  %v377_v0 = vstv %s1002_s14  ;;  %s696_s13 = scalar_lea.vmem %s1035_s17, 32  ;;  %s700_s14 = sshll.u32 %s776_s22, 4  ;;  %s701_s14 = int_to_ptr.vmem [resolvable:$false] %s700_s14 }
  0x6e   : > { %v334_v1 = vmax.f32 %v333_v58, 0.0  ;;  %v359_v2 = vmul.f32 %v358_v56, %v319_v57  ;;  %v375_v3 = vmul.f32 %v374_v63, %v289_v29  ;;  %v378_v4 = vmul.f32 %v377_v0, %v304_v41  ;;  %p697_p8 = scmp.ne.s32.totalorder %s1035_s17, %s696_s13  ;;  %p703_p2 = scmp.lt.s32.totalorder %s1035_s17, %s701_s14 }
  0x6f   : > { %v348_v5 = vadd.f32 %v347_v54, %v345_v61  ;;  %v381_v6 = vstv %s1004_s15  ;;  %v385_v7 = vstv %s1007_s30  ;;  %v389_v8 = vstv %s1009_s12  ;;  %s702_s15 = scalar_lea.vmem %s701_s14, 64 }
  0x70   : > { %v360_v9 = vadd.f32 %v359_v2, %v356_v62  ;;  %v363_v10 = vmul.f32 %v362_v59, %v334_v1  ;;  %v379_v11 = vadd.f32 %v378_v4, %v375_v3  ;;  %v382_v12 = vmul.f32 %v381_v6, %v319_v57  ;;  %p698_p13 = pnand %p697_p8, %p1102_p11  ;;  %p704_p3 = scmp.lt.s32.totalorder %s702_s15, %s696_s13 }
  0x71   : > { %v349_v13 = vmax.f32 %v348_v5, 0.0  ;;  %v386_v14 = vmul.f32 %v385_v7, %v334_v1  ;;  %v370_v19 = vstv %s1021_s16  ;;  %v393_v22 = vstv %s1025_s26 }
  0x72   : > { %v364_v15 = vadd.f32 %v363_v10, %v360_v9  ;;  %v383_v16 = vadd.f32 %v382_v12, %v379_v11  ;;  %p699_p1 = pneg %p698_p13  ;;  %p705_p4 = por %p704_p3, %p703_p2 }
  0x73   : > { %v367_v17 = vmul.f32 %v366_v60, %v349_v13  ;;  %v390_v18 = vmul.f32 %v389_v8, %v349_v13 }
  0x74   : > { %v387_v20 = vadd.f32 %v386_v14, %v383_v16  ;;  %p706_p9 = pnand %p705_p4, %p699_p1 }
  0x75   : > { %v368_v21 = vadd.f32 %v367_v17, %v364_v15 }
  0x76   : > { %v391_v23 = vadd.f32 %v390_v18, %v387_v20 }
  0x77   : > { %v371_v24 = vadd.f32 %v370_v19, %v368_v21 }
  0x78   : > { %v394_v25 = vadd.f32 %v393_v22, %v391_v23 }
  0x79   : > { %372 = vst [vmem:[%s267_s6] sm:$0x1] %v371_v24 }
  0x7a   : > { %395 = vst [vmem:[%s267_s6 + $0x1] sm:$0x1] %v394_v25 }
  0x7b   : > { %709 = shalt.err (!%p706_p9)
}
  0x7c   : > { %s710_s30 = scalar_lea.hbm %s1040_s11, 32  ;;  %s714_s16 = scalar_lea.hbm %s1087_s5, 96 }
  0x7d   : > { %p711_p7 = scmp.ne.s32.totalorder %s1040_s11, %s710_s30  ;;  %p715_p6 = scmp.lt.u32.totalorder %s1040_s11, %s1087_s5 }
  0x7e   : > { %p716_p12 = scmp.lt.u32.totalorder %s714_s16, %s710_s30  ;;  %p718_p8 = scmp.lt.u32.totalorder %s710_s30, %s1040_s11 }
  0x7f   : > { %p712_p0 = pnand %p711_p7, %p1102_p11 }
  0x80   : > { %p717_p10 = por %p716_p12, %p715_p6 }
  0x81   : > { %p713_p5 = pneg %p712_p0 }
  0x82   : > { %p719_p13 = por %p718_p8, %p717_p10 }
  0x84   : > { %p720_p1 = pnand %p719_p13, %p713_p5 }
  0x86   : > { %723 = shalt.err (!%p720_p1)
}
  0x87   : > { %572 = dma.vmem_to_hbm [thread:$0]  (%p1102_p11), %s1035_s17, 32, %s1040_s11, %s397_s10  }
  0x88 PF: > { %p599_p2 = scmp.ge.s32.totalorder %s770_s21, 2  ;;  %s422_s6 = sand.u32 1, %s758_s18  }
  0x89   : > { %p1103_p3 = scmp.ne.s32.totalorder %s1092_s29, 0  ;;  %s423_s7 = scalar_lea.sflag [#allocation3], %s422_s6 }
  0x8b   : > { %p588_p4 = pnand %p599_p2, %p1103_p3 }
  0x8d   : > { %753 = dma.done.wait (!%p588_p4), %s423_s7, 32  }
  0x8e   : > { %755 = vsyncadd (!%p588_p4), %s423_s7, 4294967264  ;;  %p18_p9 = scmp.ge.s32.totalorder %s832_s24, 5   ;;  %s1104_s18 = smov %s762_s19 }
  0x8f   : > { %s1105_s19 = smov %s766_s20  ;;  %s1106_s20 = smov %s843_s27 }
  0x90   : > { %s1107_s21 = smov %s832_s24  ;;  %20 = sbr.rel (!%p18_p9) target bundleno = 6 (0x6), region = 92 }
  0x97   :  { %428 = vsyncpa [#allocation3], 1 }
  0x98   :  { %430 = vsyncpa [#allocation3 + $0x1], 1 }
  0x99   :  { %431 = vsyncpa [#allocation4], 1 }
  0x9a   :  { %433 = vsyncpa [#allocation4 + $0x1], 1 }
  0x9b   :  { %434 = vsyncpa [#allocation6], 1 }
  0x9c   :  { %435 = vsyncpa [#allocation9], 1 }

</bundles_post_ra>
